<compile_context>
chip_gen: v6e
topology: v6e:2x2x1
jax: 0.10.0
libtpu: 0.0.40
codegen_flags: <defaults>
</compile_context>

<pallas_src>
import functools

import jax
import jax.numpy as jnp
from jax.experimental import pallas as pl
from jax.experimental.pallas import tpu as pltpu


def _iou_bce_kernel(x_ref, t_ref, o_ref, inter_acc, union_acc, bce_acc, *, n_elem):
    """x_ref/t_ref: (1, C, HW_TILE) tile of one batch element.
    o_ref: (1, C, 1) per-batch output (written once, on the last HW step).
    inter_acc/union_acc/bce_acc: (C, 1) f32 scratch accumulators that persist
    across the innermost (HW) grid axis."""
    j = pl.program_id(1)

    @pl.when(j == 0)
    def _():
        inter_acc[...] = jnp.zeros_like(inter_acc)
        union_acc[...] = jnp.zeros_like(union_acc)
        bce_acc[...] = jnp.zeros_like(bce_acc)

    x = x_ref[0].astype(jnp.float32)   # (C, HW_TILE)
    t = t_ref[0].astype(jnp.float32)   # (C, HW_TILE)

    # BCE (no logits), matching torch.nn.BCELoss: logs clamped at -100.
    log_x = jnp.maximum(jnp.log(x), -100.0)
    log_1mx = jnp.maximum(jnp.log(1.0 - x), -100.0)
    # -(t*log_x + (1-t)*log_1mx) == -(log_1mx + t*(log_x - log_1mx))  (one fewer full-tile mul)
    bce_elem = -(log_1mx + t * (log_x - log_1mx))

    # Accumulate raw per-channel sums; nonlinearity / normalization deferred to epilogue.
    inter_acc[...] += jnp.sum(x * t, axis=-1, keepdims=True)                 # (C, 1)
    union_acc[...] += (jnp.sum(x, axis=-1, keepdims=True)
                       + jnp.sum(t, axis=-1, keepdims=True))                 # (C, 1)
    bce_acc[...] += jnp.sum(bce_elem, axis=-1, keepdims=True)                # (C, 1)

    @pl.when(j == pl.num_programs(1) - 1)
    def _():
        bce = jnp.sum(bce_acc[...]) / n_elem                  # scalar: mean over C*H*W
        inter = inter_acc[...]
        union = union_acc[...]
        iou = (inter + 1.0) / (union - inter + 1.0)           # (C, 1)
        o_ref[0] = 1.0 - iou + bce                            # per-batch partial (C, 1)


def _pick_hw_tile(hw, c, itemsize, target_block_bytes=2 * 1024 * 1024):
    """Largest multiple-of-128 tile that divides hw and keeps one input block
    around ~target_block_bytes. Falls back to the full slab when hw is not a
    multiple of 128 (full-extent last dim is always a legal, unpadded block)."""
    if hw % 128 != 0:
        return hw
    cap = max(128, (target_block_bytes // (itemsize * c)) // 128 * 128)
    tile = min(hw, cap)
    while hw % tile != 0:
        tile -= 128
    return tile


def iou_bce_without_logits_loss(input_scale, target_scale, hw_tile=None):
    """input_scale/target_scale: (B, C, H, W) probabilities in [0,1] (f32 or bf16).
    Returns (C,) f32, matching the PyTorch module's output."""
    b, c, h, w = input_scale.shape
    hw = h * w
    x = input_scale.reshape(b, c, hw)
    t = target_scale.reshape(b, c, hw)

    itemsize = jnp.dtype(x.dtype).itemsize
    if hw_tile is None or hw % hw_tile != 0 or not (hw_tile % 128 == 0 or hw_tile == hw):
        hw_tile = _pick_hw_tile(hw, c, itemsize)
    n_hw = hw // hw_tile

    kernel = functools.partial(_iou_bce_kernel, n_elem=float(c * hw))

    per_batch = pl.pallas_call(
        kernel,
        out_shape=jax.ShapeDtypeStruct((b, c, 1), jnp.float32),
        grid_spec=pltpu.PrefetchScalarGridSpec(
            num_scalar_prefetch=0,
            grid=(b, n_hw),
            in_specs=[
                pl.BlockSpec((1, c, hw_tile), lambda i, j: (i, 0, j)),
                pl.BlockSpec((1, c, hw_tile), lambda i, j: (i, 0, j)),
            ],
            out_specs=pl.BlockSpec((1, c, 1), lambda i, j: (i, 0, 0)),
            scratch_shapes=[
                pltpu.VMEM((c, 1), jnp.float32),   # inter accumulator
                pltpu.VMEM((c, 1), jnp.float32),   # union accumulator
                pltpu.VMEM((c, 1), jnp.float32),   # per-channel BCE sum accumulator
            ],
        ),
        compiler_params=pltpu.CompilerParams(
            # batch axis independent -> "parallel" (megacore on v7x);
            # HW axis is a reduction into scratch -> "arbitrary", kept last.
            dimension_semantics=("parallel", "arbitrary"),
            vmem_limit_bytes=32 * 1024 * 1024,
        ),
    )(x, t)

    # total_loss / b, matching the PyTorch module (cheap: B*C elements).
    return jnp.sum(per_batch[:, :, 0], axis=0) / b


def _reference(input_scale, target_scale):
    """Pure-JAX reference mirroring the PyTorch module."""
    b = input_scale.shape[0]
    x = input_scale.astype(jnp.float32)
    t = target_scale.astype(jnp.float32)
    log_x = jnp.maximum(jnp.log(x), -100.0)
    log_1mx = jnp.maximum(jnp.log(1.0 - x), -100.0)
    bce = jnp.mean(-(t * log_x + (1.0 - t) * log_1mx), axis=(1, 2, 3))   # (B,)
    inter = jnp.sum(x * t, axis=(2, 3))                                  # (B, C)
    union = jnp.sum(x + t, axis=(2, 3))                                  # (B, C)
    iou = (inter + 1.0) / (union - inter + 1.0)
    loss = 1.0 - iou + bce[:, None]                                      # (B, C)
    return jnp.sum(loss, axis=0) / b                                     # (C,)


def _make_inputs(key, shape):
    k1, k2 = jax.random.split(key)
    inp = jax.random.uniform(k1, shape, dtype=jnp.float32,
                             minval=1e-3, maxval=1.0 - 1e-3)
    tgt = (jax.random.uniform(k2, shape, dtype=jnp.float32) > 0.5).astype(jnp.float32)
    return inp, tgt


if __name__ == "__main__":
    key = jax.random.PRNGKey(0)

    # Case 1: B=2, C=4, 16x16 (HW=256, single HW tile).
    inp, tgt = _make_inputs(key, (2, 4, 16, 16))
    out = jax.block_until_ready(iou_bce_without_logits_loss(inp, tgt))
    ref = _reference(inp, tgt)
    assert out.shape == (4,)
    assert jnp.allclose(out, ref, rtol=1e-5, atol=1e-5), (out, ref)

    # Case 2: same inputs, forced HW tiling (2 tiles of 128) to exercise the
    # multi-step scratch accumulation + epilogue path.
    out2 = jax.block_until_ready(iou_bce_without_logits_loss(inp, tgt, hw_tile=128))
    assert jnp.allclose(out2, ref, rtol=1e-5, atol=1e-5), (out2, ref)

    # Case 3: C=3 (sublane-padded), HW=60 not a multiple of 128 (full-slab fallback).
    inp3, tgt3 = _make_inputs(jax.random.PRNGKey(1), (2, 3, 6, 10))
    out3 = jax.block_until_ready(iou_bce_without_logits_loss(inp3, tgt3))
    ref3 = _reference(inp3, tgt3)
    assert out3.shape == (3,)
    assert jnp.allclose(out3, ref3, rtol=1e-5, atol=1e-5), (out3, ref3)

    print("KERNEL_OK")
</pallas_src>

<mosaic_0001>
module attributes {stable_mosaic.version = 11 : i64} {
  func.func @_iou_bce_kernel(%arg0: i32, %arg1: i32, %arg2: memref<1x4x256xf32, #tpu.memory_space<vmem>>, %arg3: memref<1x4x256xf32, #tpu.memory_space<vmem>>, %arg4: memref<1x4x1xf32, #tpu.memory_space<vmem>>, %arg5: memref<4x1xf32, #tpu.memory_space<vmem>>, %arg6: memref<4x1xf32, #tpu.memory_space<vmem>>, %arg7: memref<4x1xf32, #tpu.memory_space<vmem>>) attributes {dimension_semantics = [#tpu.dimension_semantics<parallel>, #tpu.dimension_semantics<arbitrary>], iteration_bounds = array<i64: 2, 1>, scalar_prefetch = 0 : i64, scratch_operands = 3 : i64, tpu.core_type = #tpu.core_type<tc>, window_params = [{transform_indices = @transform_0, window_bounds = array<i64: 1, 4, 256>}, {transform_indices = @transform_1, window_bounds = array<i64: 1, 4, 256>}, {transform_indices = @transform_2, window_bounds = array<i64: 1, 4, 1>}]} {
    %c0_i32 = arith.constant 0 : i32
    %0 = arith.cmpi eq, %arg1, %c0_i32 : i32
    %1 = arith.extui %0 : i1 to i32
    %c0_i32_0 = arith.constant 0 : i32
    %2 = arith.cmpi ne, %1, %c0_i32_0 : i32
    scf.if %2 {
      %cst_27 = arith.constant 0.000000e+00 : f32
      %42 = vector.broadcast %cst_27 : f32 to vector<4x1xf32>
      %c0_28 = arith.constant 0 : index
      %c0_29 = arith.constant 0 : index
      %43 = vector.load %arg5[%c0_28, %c0_29] : memref<4x1xf32, #tpu.memory_space<vmem>>, vector<4x1xf32>
      tpu.vector_store %arg5[%c0_28, %c0_29], %42 {strides = array<i32>} : memref<4x1xf32, #tpu.memory_space<vmem>>, vector<4x1xf32>,
      %cst_30 = arith.constant 0.000000e+00 : f32
      %44 = vector.broadcast %cst_30 : f32 to vector<4x1xf32>
      %c0_31 = arith.constant 0 : index
      %c0_32 = arith.constant 0 : index
      %45 = vector.load %arg6[%c0_31, %c0_32] : memref<4x1xf32, #tpu.memory_space<vmem>>, vector<4x1xf32>
      tpu.vector_store %arg6[%c0_31, %c0_32], %44 {strides = array<i32>} : memref<4x1xf32, #tpu.memory_space<vmem>>, vector<4x1xf32>,
      %cst_33 = arith.constant 0.000000e+00 : f32
      %46 = vector.broadcast %cst_33 : f32 to vector<4x1xf32>
      %c0_34 = arith.constant 0 : index
      %c0_35 = arith.constant 0 : index
      %47 = vector.load %arg7[%c0_34, %c0_35] : memref<4x1xf32, #tpu.memory_space<vmem>>, vector<4x1xf32>
      tpu.vector_store %arg7[%c0_34, %c0_35], %46 {strides = array<i32>} : memref<4x1xf32, #tpu.memory_space<vmem>>, vector<4x1xf32>,
    } else {
    }
    %c0 = arith.constant 0 : index
    %c0_1 = arith.constant 0 : index
    %c0_2 = arith.constant 0 : index
    %3 = vector.load %arg2[%c0, %c0_1, %c0_2] : memref<1x4x256xf32, #tpu.memory_space<vmem>>, vector<1x4x256xf32>
    %4 = vector.shape_cast %3 : vector<1x4x256xf32> to vector<4x256xf32>
    %c0_3 = arith.constant 0 : index
    %c0_4 = arith.constant 0 : index
    %c0_5 = arith.constant 0 : index
    %5 = vector.load %arg3[%c0_3, %c0_4, %c0_5] : memref<1x4x256xf32, #tpu.memory_space<vmem>>, vector<1x4x256xf32>
    %6 = vector.shape_cast %5 : vector<1x4x256xf32> to vector<4x256xf32>
    %7 = math.log %4 : vector<4x256xf32>
    %cst = arith.constant -1.000000e+02 : f32
    %8 = vector.broadcast %cst : f32 to vector<4x256xf32>
    %9 = arith.maximumf %7, %8 : vector<4x256xf32>
    %cst_6 = arith.constant 1.000000e+00 : f32
    %10 = vector.broadcast %cst_6 : f32 to vector<4x256xf32>
    %11 = arith.subf %10, %4 : vector<4x256xf32>
    %12 = math.log %11 : vector<4x256xf32>
    %cst_7 = arith.constant -1.000000e+02 : f32
    %13 = vector.broadcast %cst_7 : f32 to vector<4x256xf32>
    %14 = arith.maximumf %12, %13 : vector<4x256xf32>
    %15 = arith.subf %9, %14 : vector<4x256xf32>
    %16 = arith.mulf %6, %15 : vector<4x256xf32>
    %17 = arith.addf %14, %16 : vector<4x256xf32>
    %cst_8 = arith.constant 0.000000e+00 : f32
    %18 = vector.broadcast %cst_8 : f32 to vector<4x256xf32>
    %19 = arith.subf %18, %17 : vector<4x256xf32>
    %c0_9 = arith.constant 0 : index
    %c0_10 = arith.constant 0 : index
    %20 = vector.load %arg5[%c0_9, %c0_10] : memref<4x1xf32, #tpu.memory_space<vmem>>, vector<4x1xf32>
    %21 = arith.mulf %4, %6 : vector<4x256xf32>
    %cst_11 = arith.constant dense<0.000000e+00> : vector<4xf32>
    %22 = vector.multi_reduction <add>, %21, %cst_11 [1] : vector<4x256xf32> to vector<4xf32>
    %23 = vector.shape_cast %22 : vector<4xf32> to vector<4x1xf32>
    %24 = arith.addf %20, %23 : vector<4x1xf32>
    %c0_12 = arith.constant 0 : index
    %c0_13 = arith.constant 0 : index
    %25 = vector.load %arg5[%c0_12, %c0_13] : memref<4x1xf32, #tpu.memory_space<vmem>>, vector<4x1xf32>
    tpu.vector_store %arg5[%c0_12, %c0_13], %24 {strides = array<i32>} : memref<4x1xf32, #tpu.memory_space<vmem>>, vector<4x1xf32>,
    %c0_14 = arith.constant 0 : index
    %c0_15 = arith.constant 0 : index
    %26 = vector.load %arg6[%c0_14, %c0_15] : memref<4x1xf32, #tpu.memory_space<vmem>>, vector<4x1xf32>
    %cst_16 = arith.constant dense<0.000000e+00> : vector<4xf32>
    %27 = vector.multi_reduction <add>, %4, %cst_16 [1] : vector<4x256xf32> to vector<4xf32>
    %28 = vector.shape_cast %27 : vector<4xf32> to vector<4x1xf32>
    %cst_17 = arith.constant dense<0.000000e+00> : vector<4xf32>
    %29 = vector.multi_reduction <add>, %6, %cst_17 [1] : vector<4x256xf32> to vector<4xf32>
    %30 = vector.shape_cast %29 : vector<4xf32> to vector<4x1xf32>
    %31 = arith.addf %28, %30 : vector<4x1xf32>
    %32 = arith.addf %26, %31 : vector<4x1xf32>
    %c0_18 = arith.constant 0 : index
    %c0_19 = arith.constant 0 : index
    %33 = vector.load %arg6[%c0_18, %c0_19] : memref<4x1xf32, #tpu.memory_space<vmem>>, vector<4x1xf32>
    tpu.vector_store %arg6[%c0_18, %c0_19], %32 {strides = array<i32>} : memref<4x1xf32, #tpu.memory_space<vmem>>, vector<4x1xf32>,
    %c0_20 = arith.constant 0 : index
    %c0_21 = arith.constant 0 : index
    %34 = vector.load %arg7[%c0_20, %c0_21] : memref<4x1xf32, #tpu.memory_space<vmem>>, vector<4x1xf32>
    %cst_22 = arith.constant dense<0.000000e+00> : vector<4xf32>
    %35 = vector.multi_reduction <add>, %19, %cst_22 [1] : vector<4x256xf32> to vector<4xf32>
    %36 = vector.shape_cast %35 : vector<4xf32> to vector<4x1xf32>
    %37 = arith.addf %34, %36 : vector<4x1xf32>
    %c0_23 = arith.constant 0 : index
    %c0_24 = arith.constant 0 : index
    %38 = vector.load %arg7[%c0_23, %c0_24] : memref<4x1xf32, #tpu.memory_space<vmem>>, vector<4x1xf32>
    tpu.vector_store %arg7[%c0_23, %c0_24], %37 {strides = array<i32>} : memref<4x1xf32, #tpu.memory_space<vmem>>, vector<4x1xf32>,
    %c0_i32_25 = arith.constant 0 : i32
    %39 = arith.cmpi eq, %arg1, %c0_i32_25 : i32
    %40 = arith.extui %39 : i1 to i32
    %c0_i32_26 = arith.constant 0 : i32
    %41 = arith.cmpi ne, %40, %c0_i32_26 : i32
    scf.if %41 {
      %c0_27 = arith.constant 0 : index
      %c0_28 = arith.constant 0 : index
      %42 = vector.load %arg7[%c0_27, %c0_28] : memref<4x1xf32, #tpu.memory_space<vmem>>, vector<4x1xf32>
      %43 = vector.shape_cast %42 : vector<4x1xf32> to vector<1x4x1xf32>
      %cst_29 = arith.constant dense<0.000000e+00> : vector<1xf32>
      %44 = vector.multi_reduction <add>, %43, %cst_29 [1, 2] : vector<1x4x1xf32> to vector<1xf32>
      %45 = vector.shape_cast %44 : vector<1xf32> to vector<1x1x1xf32>
      %46 = vector.extract %45[0, 0, 0] : f32 from vector<1x1x1xf32>
      %cst_30 = arith.constant 1.024000e+03 : f32
      %47 = arith.divf %46, %cst_30 : f32
      %c0_31 = arith.constant 0 : index
      %c0_32 = arith.constant 0 : index
      %48 = vector.load %arg5[%c0_31, %c0_32] : memref<4x1xf32, #tpu.memory_space<vmem>>, vector<4x1xf32>
      %c0_33 = arith.constant 0 : index
      %c0_34 = arith.constant 0 : index
      %49 = vector.load %arg6[%c0_33, %c0_34] : memref<4x1xf32, #tpu.memory_space<vmem>>, vector<4x1xf32>
      %cst_35 = arith.constant 1.000000e+00 : f32
      %50 = vector.broadcast %cst_35 : f32 to vector<4x1xf32>
      %51 = arith.addf %48, %50 : vector<4x1xf32>
      %52 = arith.subf %49, %48 : vector<4x1xf32>
      %cst_36 = arith.constant 1.000000e+00 : f32
      %53 = vector.broadcast %cst_36 : f32 to vector<4x1xf32>
      %54 = arith.addf %52, %53 : vector<4x1xf32>
      %55 = arith.divf %51, %54 : vector<4x1xf32>
      %cst_37 = arith.constant 1.000000e+00 : f32
      %56 = vector.broadcast %cst_37 : f32 to vector<4x1xf32>
      %57 = arith.subf %56, %55 : vector<4x1xf32>
      %58 = vector.broadcast %47 : f32 to vector<4x1xf32>
      %59 = arith.addf %57, %58 : vector<4x1xf32>
      %c0_38 = arith.constant 0 : index
      %c0_39 = arith.constant 0 : index
      %c0_40 = arith.constant 0 : index
      %60 = vector.load %arg4[%c0_38, %c0_39, %c0_40] : memref<1x4x1xf32, #tpu.memory_space<vmem>>, vector<1x4x1xf32>
      %61 = vector.shape_cast %60 : vector<1x4x1xf32> to vector<4x1xf32>
      %62 = vector.shape_cast %59 : vector<4x1xf32> to vector<1x4x1xf32>
      tpu.vector_store %arg4[%c0_38, %c0_39, %c0_40], %62 {strides = array<i32>} : memref<1x4x1xf32, #tpu.memory_space<vmem>>, vector<1x4x1xf32>,
    } else {
    }
    return
  }
  func.func @transform_0(%arg0: i32, %arg1: i32) -> (i32, i32, i32) {
    %c0_i32 = arith.constant 0 : i32
    %c0_i32_0 = arith.constant 0 : i32
    return %arg0, %c0_i32, %arg1 : i32, i32, i32
  }
  func.func @transform_1(%arg0: i32, %arg1: i32) -> (i32, i32, i32) {
    %c0_i32 = arith.constant 0 : i32
    %c0_i32_0 = arith.constant 0 : i32
    return %arg0, %c0_i32, %arg1 : i32, i32, i32
  }
  func.func @transform_2(%arg0: i32, %arg1: i32) -> (i32, i32, i32) {
    %c0_i32 = arith.constant 0 : i32
    %c0_i32_0 = arith.constant 0 : i32
    %c0_i32_1 = arith.constant 0 : i32
    return %arg0, %c0_i32, %c0_i32_0 : i32, i32, i32
  }
}

</mosaic_0001>

<bundles_post_ra>
// kernel: tpu_custom_call.1
= control target key start
LH: loop header
LB: loop body
LE: loop exit
PB: predicated region body
PF: predicated region fallthrough
CT: control target
= control target key end

     0   :  { %7 = vsyncpa [#allocation6], 0  ;;  %s775_s0 = inlined_call_operand.hbm [shape: f32[2,4,256], index: 0, kind: input, shape index: {}]   ;;  %s776_s1 = inlined_call_operand.hbm [shape: f32[2,4,256], index: 1, kind: input, shape index: {}]   ;;  %s777_s2 = inlined_call_operand.vmem [shape: f32[2,4,1], index: 2, kind: output, shape index: {}]  }
   0x1   :  { %9 = vsyncpa [#allocation6 + $0x1], 0 }
   0x2   :  { %10 = vsyncpa [#allocation8], 0 }
   0x3   :  { %12 = vsyncpa [#allocation8 + $0x1], 0  ;;  %s633_s9 = smov 0   ;;  %s635_s10 = smov 0  }
   0x4   :  { %s637_s11 = smov 0   ;;  %s639_s12 = smov 0  }
   0x5   :  { %s641_s13 = smov 0   ;;  %s643_s14 = smov 0  }
   0x6 LB: > { %s416_s15 = sadd.s32 4294967295, %s613_s14   ;;  %s30_s16 = sadd.s32 1, %s609_s13  ;;  %s613_s14 = sphi %s643_s14, %s18_s14   ;;  %s609_s13 = sphi %s641_s13, %s786_s13   ;;  %s605_s12 = sphi %s639_s12, %s785_s12   ;;  %s601_s11 = sphi %s637_s11, %s784_s11   ;;  %s597_s10 = sphi %s635_s10, %s783_s10   ;;  %s593_s9 = sphi %s633_s9, %s782_s9  }
   0x7   : > { %p32_p0 = scmp.ge.s32.totalorder %s30_s16, 2  ;;  %s39_s17 = sadd.s32 1, %s601_s11 }
   0x8   : > { %p46_p1 = scmp.ne.s32.totalorder %s601_s11, %s597_s10  ;;  %p47_p2 = scmp.eq.s32.totalorder %s613_s14, 0 }
   0x9   : > { %s788_s16 = smov (%p32_p0, %s30_s16), 0  ;;  %p52_p4 = scmp.ne.s32.totalorder %s597_s10, %s593_s9 }
   0xa   : > { %p669_p3 = por %p47_p2, %p46_p1  ;;  %s34_s19 = ssub.s32 %s609_s13, %s788_s16 }
   0xb   : > { %p53_p5 = scmp.eq.s32.totalorder %s416_s15, 0  ;;  %p37_p6 = scmp.eq.s32.totalorder %s34_s19, 0 }
   0xc   : > { %p447_p8 = scmp.lt.s32.totalorder %s613_s14, 2  ;;  %s685_s22 = sand.u32 1, %s601_s11  }
   0xd   : > { %p676_p7 = por %p53_p5, %p52_p4  ;;  %s432_s23 = sshll.u32 %s609_s13, 7 }
   0xe   : > { %s682_s21 = scalar_select %p37_p6, %s601_s11, %s39_s17  }
   0xf   : > { %s420_s24 = sshll.u32 %s685_s22, 3  ;;  %s142_s27 = scalar_lea.hbm %s775_s0, %s432_s23 }
  0x10   : > { %s134_s28 = scalar_lea.vmem [#allocation5], %s420_s24  ;;  %p694_p9 = pnand %p447_p8, %p669_p3 }
  0x11   : > { %s144_s29 = sshll.u32 %s134_s28, 4  ;;  %p426_p10 = scmp.ge.s32.totalorder %s613_s14, 1  ;;  %s145_s29 = int_to_ptr.vmem [resolvable:$true] %s144_s29 }
  0x12   : > { %p170_p11 = scmp.lt.s32.totalorder %s613_s14, 3  ;;  %s131_s3 = scalar_lea.sflag [#allocation6], %s685_s22 }
  0x13   : > { %p505_p12 = pneg %p694_p9  ;;  %s516_s4 = scalar_lea.vmem %s145_s29, 128 }
  0x14   : > { %p517_p13 = scmp.ne.s32.totalorder %s145_s29, %s516_s4  ;;  %s615_s5 = smov [#allocation5]  }
  0x15   : > { %s521_s6 = sshll.u32 %s615_s5, 4  ;;  %s522_s6 = int_to_ptr.vmem [resolvable:$false] %s521_s6 }
  0x16   : > { %p519_p0 = pnand %p517_p13, %p505_p12  ;;  %s523_s7 = scalar_lea.vmem %s522_s6, 256 }
  0x17   : > { %p524_p2 = scmp.lt.s32.totalorder %s145_s29, %s522_s6  ;;  %p525_p3 = scmp.lt.s32.totalorder %s523_s7, %s516_s4 }
  0x18   : > { %p520_p1 = pneg %p519_p0 }
  0x19   : > { %p526_p4 = por %p525_p3, %p524_p2 }
  0x1b   : > { %p527_p5 = pnand %p526_p4, %p520_p1 }
  0x1d   : > { %530 = shalt.err (!%p527_p5)
}
  0x1e   : > { %443 = dma.hbm_to_vmem [thread:$0]  (!%p694_p9), %s142_s27, 128, %s145_s29, %s131_s3  }
  0x1f   : > { %p712_p6 = pnand %p426_p10, %p170_p11  ;;  %s163_s17 = scalar_lea.hbm %s776_s1, %s432_s23 }
  0x20   : > { %s155_s18 = scalar_lea.vmem [#allocation7], %s420_s24  ;;  %s152_s25 = scalar_lea.sflag [#allocation8], %s685_s22 }
  0x21   : > { %s165_s19 = sshll.u32 %s155_s18, 4  ;;  %s616_s27 = smov [#allocation7]   ;;  %s166_s19 = int_to_ptr.vmem [resolvable:$true] %s165_s19 }
  0x22   : > { %s544_s26 = scalar_lea.vmem %s166_s19, 128  ;;  %s549_s28 = sshll.u32 %s616_s27, 4  ;;  %s550_s28 = int_to_ptr.vmem [resolvable:$false] %s549_s28 }
  0x23   : > { %p545_p8 = scmp.ne.s32.totalorder %s166_s19, %s544_s26  ;;  %s551_s29 = scalar_lea.vmem %s550_s28, 256 }
  0x24   : > { %p552_p10 = scmp.lt.s32.totalorder %s166_s19, %s550_s28  ;;  %p553_p11 = scmp.lt.s32.totalorder %s551_s29, %s544_s26 }
  0x25   : > { %p547_p13 = pnand %p545_p8, %p505_p12 }
  0x26   : > { %p554_p1 = por %p553_p11, %p552_p10 }
  0x27   : > { %p548_p0 = pneg %p547_p13 }
  0x29   : > { %p555_p2 = pnand %p554_p1, %p548_p0 }
  0x2b   : > { %558 = shalt.err (!%p555_p2)
}
  0x2c   : > { %446 = dma.hbm_to_vmem [thread:$0]  (!%p694_p9), %s163_s17, 128, %s166_s19, %s152_s25  }
  0x2d   : > { %174 = sbr.rel (%p712_p6) target bundleno = 442 (0x1ba), region = 28  ;;  %s176_s22 = sand.u32 (!%p712_p6), 1, %s597_s10  }
  0x2e   : > { %s427_s23 = sshll.u32 (!%p712_p6), %s176_s22, 3  ;;  %s177_s24 = scalar_lea.sflag (!%p712_p6), [#allocation6], %s176_s22 }
  0x2f   : > { %s180_s3 = scalar_lea.vmem (!%p712_p6), [#allocation5], %s427_s23 }
  0x32   : > { %584 = dma.done.wait (%p676_p7), %s177_s24, 128  }
  0x33   : > { %586 = vsyncadd (%p676_p7), %s177_s24, 4294967168  ;;  %s186_s4 = scalar_lea.sflag [#allocation8], %s176_s22  ;;  %s189_s5 = scalar_lea.vmem [#allocation7], %s427_s23 }
  0x34   : > { %588 = dma.done.wait (%p676_p7), %s186_s4, 128  }
  0x35   : > { %590 = vsyncadd (%p676_p7), %s186_s4, 4294967168  ;;  %vm224_vm0 = vcmask 3072   ;;  %v617_v0 = vmov 0.0   ;;  %v228_v1 = vld [vmem:[%s180_s3] sm:$0xff]  ;;  %v229_v9 = vld [vmem:[%s189_s5] sm:$0xff]  ;;  %vm246_vm1 = vcmask 1043456  }
  0x36   : > { %227 = vst.msk [vmem:[#allocation4] sm:$0xf] %vm224_vm0, %v617_v0  ;;  %225 = vst.msk [vmem:[#allocation2] sm:$0xf] %vm224_vm0, %v617_v0  ;;  %497 = vlog2.f32 %v228_v1  ;;  %v233_v2 = vsub.f32 1.0, %v228_v1  ;;  %v257_v18 = vcombine.high %v228_v1, %v228_v1  ;;  %v259_v19 = vsel %vm246_vm1, %v228_v1, 0.0 }
  0x37   : > { %226 = vst.msk [vmem:[#allocation3] sm:$0xf] %vm224_vm0, %v617_v0  ;;  %v265_v20 = vcombine.high %v229_v9, %v229_v9  ;;  %v242_v21 = vmul.f32 %v229_v9, %v228_v1  ;;  %v267_v23 = vsel %vm246_vm1, %v229_v9, 0.0  ;;  %p216_p7 = scmp.lt.s32.totalorder %s605_s12, 1 }
  0x38   : > { %499 = vlog2.f32 %v233_v2  ;;  %v260_v22 = vsel %vm246_vm1, %v257_v18, 0.0 }
  0x39   : > { %v268_v24 = vsel %vm246_vm1, %v265_v20, 0.0  ;;  %v261_v25 = vadd.f32 %v260_v22, %v259_v19  ;;  %v244_v26 = vcombine.high %v242_v21, %v242_v21  ;;  %v247_v27 = vsel %vm246_vm1, %v242_v21, 0.0  ;;  %s790_s12 = smov (!%p216_p7, %s605_s12), 1 }
  0x3a   : > { %v269_v28 = vadd.f32 %v268_v24, %v267_v23  ;;  %s429_s20 = sshll.u32 %s790_s12, 2 }
  0x3b   : > { %262 = vadd.xlane.f32.xlu1 %v261_v25  ;;  %v248_v29 = vsel %vm246_vm1, %v244_v26, 0.0  ;;  %s219_s9 = scalar_lea.vmem %s777_s2, %s429_s20 }
  0x3c   : > { %v249_v30 = vadd.f32 %v248_v29, %v247_v27 }
  0x3d   : > { %v275_v31 = vld [vmem:[#allocation4] sm:$0xf]  ;;  %v241_v43 = vld [vmem:[#allocation2] sm:$0xf] }
  0x3e   : > { %v255_v38 = vld [vmem:[#allocation3] sm:$0xf] }
  0x3f   : > { %270 = vadd.xlane.f32.xlu1 %v269_v28 }
  0x43   : > { %v498_v3 = vpop.eup %497 }
  0x44   : > { %v231_v4 = vmul.f32 0.6931472, %v498_v3 }
  0x45   : > { %v500_v5 = vpop.eup %499 }
  0x46   : > { %v232_v6 = vmax.f32 %v231_v4, -100.0  ;;  %v235_v7 = vmul.f32 0.6931472, %v500_v5 }
  0x48   : > { %v236_v8 = vmax.f32 %v235_v7, -100.0 }
  0x4a   : > { %v237_v10 = vsub.f32 %v232_v6, %v236_v8 }
  0x4c   : > { %v238_v11 = vmul.f32 %v237_v10, %v229_v9 }
  0x4e   : > { %v239_v12 = vadd.f32 %v238_v11, %v236_v8 }
  0x50   : > { %v240_v13 = vsub.f32 0.0, %v239_v12 }
  0x52   : > { %v277_v14 = vcombine.high %v240_v13, %v240_v13  ;;  %v279_v15 = vsel %vm246_vm1, %v240_v13, 0.0 }
  0x54   : > { %v280_v16 = vsel %vm246_vm1, %v277_v14, 0.0 }
  0x55   : > { %v281_v17 = vadd.f32 %v280_v16, %v279_v15 }
  0x57   : > { %282 = vadd.xlane.f32.xlu0 %v281_v17 }
  0xc4   : > { %v263_v36 = vpop.xlane.xlu1 %262 }
  0xc8   : > { %v271_v37 = vpop.xlane.xlu1 %270 }
  0xc9   : > { %v272_v39 = vadd.f32 %v271_v37, %v263_v36 }
  0xcb   : > { %v273_v40 = vadd.f32 %v272_v39, %v255_v38 }
  0xcd   : > { %274 = vst.msk [vmem:[#allocation3] sm:$0xf] %vm224_vm0, %v273_v40 }
  0xd4   : > { %v304_v52 = vld [vmem:[#allocation3] sm:$0xf] }
  0xe0   : > { %v283_v32 = vpop.xlane.xlu0 %282 }
  0xe1   : > { %v284_v33 = vadd.f32 %v283_v32, %v275_v31 }
  0xe3   : > { %285 = vst.msk [vmem:[#allocation4] sm:$0xf] %vm224_vm0, %v284_v33 }
  0xea   : > { %v289_v34 = vld [vmem:[#allocation4] sm:$0xf] }
  0xeb   : > { %v290_v35 = vsel %vm224_vm0, %v289_v34, 0.0 }
  0xec   : > { %291 = vadd.xlane.f32.xlu0 %v290_v35 }
  0xf0   : > { %250 = vadd.xlane.f32.xlu0 %v249_v30 }
 0x175   : > { %v292_v41 = vpop.xlane.xlu0 %291 }
 0x176   : > { %v293_v42 = vrot.slane %v292_v41, 4 }
 0x178   : > { %v294_v44 = vadd.f32 %v293_v42, %v292_v41 }
 0x179   : > { %v251_v45 = vpop.xlane.xlu0 %250 }
 0x17a   : > { %v295_v46 = vrot.slane %v294_v44, 2  ;;  %v252_v47 = vadd.f32 %v251_v45, %v241_v43 }
 0x17c   : > { %v296_v48 = vadd.f32 %v295_v46, %v294_v44  ;;  %254 = vst.msk [vmem:[#allocation2] sm:$0xf] %vm224_vm0, %v252_v47 }
 0x17e   : > { %v297_v49 = vrot.slane %v296_v48, 1 }
 0x180   : > { %v298_v50 = vadd.f32 %v297_v49, %v296_v48 }
 0x182   : > { %434 = vpush %v298_v50 }
 0x183   : > { %v303_v51 = vld [vmem:[#allocation2] sm:$0xf] }
 0x184   : > { %v306_v53 = vsub.f32 %v304_v52, %v303_v51  ;;  %v305_v55 = vadd.f32 1.0, %v303_v51 }
 0x186   : > { %v307_v54 = vadd.f32 1.0, %v306_v53 }
 0x188   : > { %501 = vrcp.f32 %v307_v54 }
 0x195   : > { %v502_v56 = vpop.eup %501 }
 0x196   : > { %v309_v57 = vmul.f32 %v502_v56, %v305_v55 }
 0x198   : > { %v310_v58 = vsub.f32 1.0, %v309_v57 }
 0x1b3   : > { %s435_s30 = spop %434 }
 0x1b4   : > { %s302_s6 = smul.f32 0.0009765625, %s435_s30 }
 0x1b6   : > { %v311_v59 = vstv %s302_s6 }
 0x1b7   : > { %v312_v60 = vadd.f32 %v311_v59, %v310_v58 }
 0x1b9   : > { %313 = vst.msk [vmem:[%s219_s9] sm:$0xf] %vm224_vm0, %v312_v60 }
 0x1ba PF: > { %s18_s14 = sadd.s32 1, %s613_s14   ;;  %s782_s9 = smov %s597_s10 }
 0x1bb   : > { %p15_p9 = scmp.ge.s32.totalorder %s18_s14, 4   ;;  %s783_s10 = smov %s601_s11 }
 0x1bc   : > { %s784_s11 = smov %s682_s21  ;;  %s785_s12 = smov %s609_s13 }
 0x1bd   : > { %s786_s13 = smov %s788_s16  ;;  %17 = sbr.rel (!%p15_p9) target bundleno = 6 (0x6), region = 89 }
 0x1c2   :  { %333 = vsyncpa [#allocation6], 1 }
 0x1c3   :  { %335 = vsyncpa [#allocation6 + $0x1], 1 }
 0x1c4   :  { %336 = vsyncpa [#allocation8], 1 }
 0x1c5   :  { %338 = vsyncpa [#allocation8 + $0x1], 1 }

</bundles_post_ra>
